<compile_context>
chip_gen: v7x
topology: tpu7x:2x2x1
jax: 0.10.0
libtpu: 0.0.40
codegen_flags: <defaults>
</compile_context>

<pallas_src>
import jax
import jax.numpy as jnp
from jax.experimental import pallas as pl
from jax.experimental.pallas import tpu as pltpu

KSIZE = 4
STRIDE = 2
PAD = 1
EPS = 1e-5          # InstanceNorm2d default eps
NEG_SLOPE = 0.2     # LeakyReLU slope


def _round_up(a, b):
    return (a + b - 1) // b * b


def _pick_vmem_limit_bytes():
    """Per-generation VMEM cap: tight on v7x (64 MiB/TC), generous on v5e/v6e."""
    cap = None
    try:
        info = pltpu.get_tpu_info()
        cap = getattr(info, "vmem_capacity_bytes", None)
    except Exception:
        cap = None
    if cap is None:
        cap = 64 * 1024 * 1024          # conservative fallback (v7x per-TC VMEM)
    if cap <= 64 * 1024 * 1024:
        return 36 * 1024 * 1024          # v7x: leave pipeline headroom
    return 100 * 1024 * 1024             # v5e / v6e (128 MiB physical)


def _unet_down_kernel(x_ref, w_ref, o_ref, acc_ref):
    # x_ref:   (1, Hg, Wg, 4*Cin)   bf16  space-to-depth padded input, one sample
    # w_ref:   (2, 2, 4*Cin, CT)    bf16  per-cell-offset weight matrices (Cout tile)
    # o_ref:   (1, Ho, Wo, CT)      bf16  output tile (lane-dense, CT % 128 == 0)
    # acc_ref: (Ho, Wo, CT)         f32   VMEM scratch accumulator
    _, ho, wo, ct = o_ref.shape
    cin4 = x_ref.shape[-1]

    # ---- convolution: 4 accumulated MXU matmuls (bf16 in / f32 acc in VMEM) ----
    # The (dh, dw) tap shift is applied to the small bf16 input operand, not to
    # the f32 matmul output.
    first = True
    for dh in range(2):
        for dw in range(2):
            x_tap = x_ref[0, dh:dh + ho, dw:dw + wo, :]        # (Ho, Wo, 4*Cin) bf16
            x2d = x_tap.reshape(ho * wo, cin4)
            z = jnp.dot(x2d, w_ref[dh, dw],
                        preferred_element_type=jnp.float32)     # (Ho*Wo, CT) f32
            z3 = z.reshape(ho, wo, ct)
            if first:
                acc_ref[...] = z3
                first = False
            else:
                acc_ref[...] += z3

    # ---- InstanceNorm2d (affine=False): two-pass centered variance ----
    inv_p = 1.0 / float(ho * wo)
    mean = jnp.sum(acc_ref[...], axis=(0, 1), keepdims=True) * inv_p     # (1,1,CT)
    diff = acc_ref[...] - mean
    var = jnp.sum(diff * diff, axis=(0, 1), keepdims=True) * inv_p       # biased var
    y = (acc_ref[...] - mean) * jax.lax.rsqrt(var + EPS)                 # rsqrt -> EUP

    # ---- LeakyReLU(0.2) + lane-dense bf16 store ----
    o_ref[0] = jnp.where(y >= 0, y, NEG_SLOPE * y).astype(o_ref.dtype)


def unet_down(x_nchw, weight, *, nchw_f32_out=True):
    """Forward pass of UNetDown (normalize=True, dropout=0.0).

    x_nchw: (N, Cin, H, W) float32 (or bf16)
    weight: (Cout, Cin, 4, 4) float32 (PyTorch Conv2d layout, bias=False)
    returns: (N, Cout, H//2, W//2) float32 NCHW if nchw_f32_out else
             (N, H//2, W//2, Cout) bf16 NHWC (for stacking UNetDown blocks).
    """
    n, cin, h, w = x_nchw.shape
    cout, cin_w, kh, kw = weight.shape
    assert (cin_w, kh, kw) == (cin, KSIZE, KSIZE)
    assert h % 2 == 0 and w % 2 == 0
    ho, wo = h // 2, w // 2
    hg = ho + 1                       # space-to-depth grid height ((H+2)/2)
    wp2 = wo + 1                      # space-to-depth grid width  ((W+2)/2)
    wg = _round_up(wp2, 16)           # bf16 sublane tile is 16 -> align W axis
    cin4 = 4 * cin
    coutp = _round_up(cout, 128)      # lane-dense output channels

    # Cout tile: 256-wide for deep layers (fills v6e/v7x MXU N), else 128 so the
    # Cout grid axis can also feed both v7x TensorCores at N==1.
    ct = 256 if (coutp % 256 == 0 and coutp >= 512) else 128
    nct = coutp // ct

    # ---- input prep (bf16-first): pad -> NHWC -> space-to-depth(2) ----
    xb = x_nchw.astype(jnp.bfloat16)
    xp = jnp.pad(xb, ((0, 0), (0, 0), (PAD, PAD), (PAD, PAD)))        # (N,Cin,H+2,W+2)
    x_nhwc = xp.transpose(0, 2, 3, 1)                                 # (N,H+2,W+2,Cin)
    x_s2d = x_nhwc.reshape(n, hg, 2, wp2, 2, cin)
    x_s2d = x_s2d.transpose(0, 1, 3, 2, 4, 5).reshape(n, hg, wp2, cin4)
    x_s2d = jnp.pad(x_s2d, ((0, 0), (0, 0), (0, wg - wp2), (0, 0)))   # (N,Hg,Wg,4Cin)

    # ---- weight prep: (Cout,Cin,4,4) -> (2,2,4*Cin,Coutp), bf16, zero-padded ----
    # kh = 2*dh + phh, kw = 2*dw + pww ; s2d channel index = (phh*2+pww)*Cin + ci
    w6 = weight.astype(jnp.bfloat16).reshape(cout, cin, 2, 2, 2, 2)   # (co,ci,dh,phh,dw,pww)
    w6 = w6.transpose(2, 4, 3, 5, 1, 0)                               # (dh,dw,phh,pww,ci,co)
    w_s2d = w6.reshape(2, 2, cin4, cout)
    w_s2d = jnp.pad(w_s2d, ((0, 0), (0, 0), (0, 0), (0, coutp - cout)))

    cost = pl.CostEstimate(
        flops=2 * n * ho * wo * (4 * cin4) * coutp,
        transcendentals=n * coutp,
        bytes_accessed=(nct * x_s2d.size * 2 + w_s2d.size * 2
                        + n * ho * wo * coutp * 2),
    )

    out = pl.pallas_call(
        _unet_down_kernel,
        out_shape=jax.ShapeDtypeStruct((n, ho, wo, coutp), jnp.bfloat16),
        grid_spec=pltpu.PrefetchScalarGridSpec(
            num_scalar_prefetch=0,
            # Cout-tile-major grid: each weight tile is DMA'd once, then reused
            # across the whole batch; both axes are independent ("parallel").
            grid=(nct, n),
            in_specs=[
                pl.BlockSpec((1, hg, wg, cin4), lambda c, b: (b, 0, 0, 0)),
                pl.BlockSpec((2, 2, cin4, ct), lambda c, b: (0, 0, 0, c)),
            ],
            out_specs=pl.BlockSpec((1, ho, wo, ct), lambda c, b: (b, 0, 0, c)),
            scratch_shapes=[pltpu.VMEM((ho, wo, ct), jnp.float32)],
        ),
        compiler_params=pltpu.CompilerParams(
            dimension_semantics=("parallel", "parallel"),
            vmem_limit_bytes=_pick_vmem_limit_bytes(),
        ),
        cost_estimate=cost,
    )(x_s2d, w_s2d)

    out = out[..., :cout]                         # strip Cout padding (NHWC bf16)
    if nchw_f32_out:
        # Network-boundary conversion only; when stacking UNetDown blocks keep
        # NHWC/bf16 (nchw_f32_out=False) and skip this extra HBM pass.
        return out.transpose(0, 3, 1, 2).astype(jnp.float32)
    return out


def _reference(x_nchw, weight):
    """Pure-JAX f32 reference for sanity check."""
    y = jax.lax.conv_general_dilated(
        x_nchw, weight,
        window_strides=(STRIDE, STRIDE),
        padding=((PAD, PAD), (PAD, PAD)),
        dimension_numbers=("NCHW", "OIHW", "NCHW"),
    )
    mean = jnp.mean(y, axis=(2, 3), keepdims=True)
    var = jnp.mean((y - mean) ** 2, axis=(2, 3), keepdims=True)
    yn = (y - mean) * jax.lax.rsqrt(var + EPS)
    return jnp.where(yn >= 0, yn, NEG_SLOPE * yn)


if __name__ == "__main__":
    key = jax.random.PRNGKey(0)
    kx, kw = jax.random.split(key)

    N, Cin, H, W = 2, 4, 16, 16
    Cout = 8

    x = jax.random.normal(kx, (N, Cin, H, W), dtype=jnp.float32)
    weight = 0.1 * jax.random.normal(kw, (Cout, Cin, KSIZE, KSIZE), dtype=jnp.float32)

    fwd = jax.jit(unet_down)
    out = fwd(x, weight)
    jax.block_until_ready(out)

    ref = _reference(x, weight)
    assert out.shape == (N, Cout, H // 2, W // 2), out.shape
    # bf16 MXU inputs + bf16 output store -> looser tolerance than pure f32
    assert jnp.allclose(out, ref, atol=1e-1, rtol=1e-1), \
        float(jnp.max(jnp.abs(out - ref)))

    print("KERNEL_OK")
</pallas_src>

<mosaic_0001>
module attributes {stable_mosaic.version = 11 : i64} {
  func.func @_unet_down_kernel(%arg0: i32, %arg1: i32, %arg2: memref<1x9x16x16xbf16, #tpu.memory_space<vmem>>, %arg3: memref<2x2x16x128xbf16, #tpu.memory_space<vmem>>, %arg4: memref<1x8x8x128xbf16, #tpu.memory_space<vmem>>, %arg5: memref<8x8x128xf32, #tpu.memory_space<vmem>>) attributes {dimension_semantics = [#tpu.dimension_semantics<parallel>, #tpu.dimension_semantics<parallel>], iteration_bounds = array<i64: 1, 2>, scalar_prefetch = 0 : i64, scratch_operands = 1 : i64, tpu.core_type = #tpu.core_type<tc>, window_params = [{transform_indices = @transform_0, window_bounds = array<i64: 1, 9, 16, 16>}, {transform_indices = @transform_1, window_bounds = array<i64: 2, 2, 16, 128>}, {transform_indices = @transform_2, window_bounds = array<i64: 1, 8, 8, 128>}]} {
    %c0 = arith.constant 0 : index
    %c0_0 = arith.constant 0 : index
    %c0_1 = arith.constant 0 : index
    %c0_2 = arith.constant 0 : index
    %0 = vector.load %arg2[%c0, %c0_0, %c0_1, %c0_2] : memref<1x9x16x16xbf16, #tpu.memory_space<vmem>>, vector<1x8x8x16xbf16>
    %1 = vector.shape_cast %0 : vector<1x8x8x16xbf16> to vector<8x8x16xbf16>
    %2 = vector.shape_cast %1 : vector<8x8x16xbf16> to vector<64x16xbf16>
    %c0_3 = arith.constant 0 : index
    %c0_4 = arith.constant 0 : index
    %c0_5 = arith.constant 0 : index
    %c0_6 = arith.constant 0 : index
    %3 = vector.load %arg3[%c0_3, %c0_4, %c0_5, %c0_6] : memref<2x2x16x128xbf16, #tpu.memory_space<vmem>>, vector<1x1x16x128xbf16>
    %4 = vector.shape_cast %3 : vector<1x1x16x128xbf16> to vector<16x128xbf16>
    %cst = arith.constant dense<0.000000e+00> : vector<64x128xf32>
    %5 = tpu.matmul %2, %4, %cst {dimension_numbers = #tpu.dot_dimension_numbers<[1], [0], [0], [1], [0, 0, 1, 1], [], []>} : vector<64x16xbf16>, vector<16x128xbf16>, vector<64x128xf32> -> vector<64x128xf32>
    %6 = vector.shape_cast %5 : vector<64x128xf32> to vector<8x8x128xf32>
    %c0_7 = arith.constant 0 : index
    %c0_8 = arith.constant 0 : index
    %c0_9 = arith.constant 0 : index
    %7 = vector.load %arg5[%c0_7, %c0_8, %c0_9] : memref<8x8x128xf32, #tpu.memory_space<vmem>>, vector<8x8x128xf32>
    tpu.vector_store %arg5[%c0_7, %c0_8, %c0_9], %6 {strides = array<i32>} : memref<8x8x128xf32, #tpu.memory_space<vmem>>, vector<8x8x128xf32>,
    %c0_10 = arith.constant 0 : index
    %c0_11 = arith.constant 0 : index
    %c1 = arith.constant 1 : index
    %c0_12 = arith.constant 0 : index
    %8 = vector.load %arg2[%c0_10, %c0_11, %c1, %c0_12] : memref<1x9x16x16xbf16, #tpu.memory_space<vmem>>, vector<1x8x8x16xbf16>
    %9 = vector.shape_cast %8 : vector<1x8x8x16xbf16> to vector<8x8x16xbf16>
    %10 = vector.shape_cast %9 : vector<8x8x16xbf16> to vector<64x16xbf16>
    %c0_13 = arith.constant 0 : index
    %c1_14 = arith.constant 1 : index
    %c0_15 = arith.constant 0 : index
    %c0_16 = arith.constant 0 : index
    %11 = vector.load %arg3[%c0_13, %c1_14, %c0_15, %c0_16] : memref<2x2x16x128xbf16, #tpu.memory_space<vmem>>, vector<1x1x16x128xbf16>
    %12 = vector.shape_cast %11 : vector<1x1x16x128xbf16> to vector<16x128xbf16>
    %cst_17 = arith.constant dense<0.000000e+00> : vector<64x128xf32>
    %13 = tpu.matmul %10, %12, %cst_17 {dimension_numbers = #tpu.dot_dimension_numbers<[1], [0], [0], [1], [0, 0, 1, 1], [], []>} : vector<64x16xbf16>, vector<16x128xbf16>, vector<64x128xf32> -> vector<64x128xf32>
    %14 = vector.shape_cast %13 : vector<64x128xf32> to vector<8x8x128xf32>
    %c0_18 = arith.constant 0 : index
    %c0_19 = arith.constant 0 : index
    %c0_20 = arith.constant 0 : index
    %15 = vector.load %arg5[%c0_18, %c0_19, %c0_20] : memref<8x8x128xf32, #tpu.memory_space<vmem>>, vector<8x8x128xf32>
    %16 = arith.addf %15, %14 : vector<8x8x128xf32>
    %c0_21 = arith.constant 0 : index
    %c0_22 = arith.constant 0 : index
    %c0_23 = arith.constant 0 : index
    %17 = vector.load %arg5[%c0_21, %c0_22, %c0_23] : memref<8x8x128xf32, #tpu.memory_space<vmem>>, vector<8x8x128xf32>
    tpu.vector_store %arg5[%c0_21, %c0_22, %c0_23], %16 {strides = array<i32>} : memref<8x8x128xf32, #tpu.memory_space<vmem>>, vector<8x8x128xf32>,
    %c0_24 = arith.constant 0 : index
    %c1_25 = arith.constant 1 : index
    %c0_26 = arith.constant 0 : index
    %c0_27 = arith.constant 0 : index
    %18 = vector.load %arg2[%c0_24, %c1_25, %c0_26, %c0_27] : memref<1x9x16x16xbf16, #tpu.memory_space<vmem>>, vector<1x8x8x16xbf16>
    %19 = vector.shape_cast %18 : vector<1x8x8x16xbf16> to vector<8x8x16xbf16>
    %20 = vector.shape_cast %19 : vector<8x8x16xbf16> to vector<64x16xbf16>
    %c1_28 = arith.constant 1 : index
    %c0_29 = arith.constant 0 : index
    %c0_30 = arith.constant 0 : index
    %c0_31 = arith.constant 0 : index
    %21 = vector.load %arg3[%c1_28, %c0_29, %c0_30, %c0_31] : memref<2x2x16x128xbf16, #tpu.memory_space<vmem>>, vector<1x1x16x128xbf16>
    %22 = vector.shape_cast %21 : vector<1x1x16x128xbf16> to vector<16x128xbf16>
    %cst_32 = arith.constant dense<0.000000e+00> : vector<64x128xf32>
    %23 = tpu.matmul %20, %22, %cst_32 {dimension_numbers = #tpu.dot_dimension_numbers<[1], [0], [0], [1], [0, 0, 1, 1], [], []>} : vector<64x16xbf16>, vector<16x128xbf16>, vector<64x128xf32> -> vector<64x128xf32>
    %24 = vector.shape_cast %23 : vector<64x128xf32> to vector<8x8x128xf32>
    %c0_33 = arith.constant 0 : index
    %c0_34 = arith.constant 0 : index
    %c0_35 = arith.constant 0 : index
    %25 = vector.load %arg5[%c0_33, %c0_34, %c0_35] : memref<8x8x128xf32, #tpu.memory_space<vmem>>, vector<8x8x128xf32>
    %26 = arith.addf %25, %24 : vector<8x8x128xf32>
    %c0_36 = arith.constant 0 : index
    %c0_37 = arith.constant 0 : index
    %c0_38 = arith.constant 0 : index
    %27 = vector.load %arg5[%c0_36, %c0_37, %c0_38] : memref<8x8x128xf32, #tpu.memory_space<vmem>>, vector<8x8x128xf32>
    tpu.vector_store %arg5[%c0_36, %c0_37, %c0_38], %26 {strides = array<i32>} : memref<8x8x128xf32, #tpu.memory_space<vmem>>, vector<8x8x128xf32>,
    %c0_39 = arith.constant 0 : index
    %c1_40 = arith.constant 1 : index
    %c1_41 = arith.constant 1 : index
    %c0_42 = arith.constant 0 : index
    %28 = vector.load %arg2[%c0_39, %c1_40, %c1_41, %c0_42] : memref<1x9x16x16xbf16, #tpu.memory_space<vmem>>, vector<1x8x8x16xbf16>
    %29 = vector.shape_cast %28 : vector<1x8x8x16xbf16> to vector<8x8x16xbf16>
    %30 = vector.shape_cast %29 : vector<8x8x16xbf16> to vector<64x16xbf16>
    %c1_43 = arith.constant 1 : index
    %c1_44 = arith.constant 1 : index
    %c0_45 = arith.constant 0 : index
    %c0_46 = arith.constant 0 : index
    %31 = vector.load %arg3[%c1_43, %c1_44, %c0_45, %c0_46] : memref<2x2x16x128xbf16, #tpu.memory_space<vmem>>, vector<1x1x16x128xbf16>
    %32 = vector.shape_cast %31 : vector<1x1x16x128xbf16> to vector<16x128xbf16>
    %cst_47 = arith.constant dense<0.000000e+00> : vector<64x128xf32>
    %33 = tpu.matmul %30, %32, %cst_47 {dimension_numbers = #tpu.dot_dimension_numbers<[1], [0], [0], [1], [0, 0, 1, 1], [], []>} : vector<64x16xbf16>, vector<16x128xbf16>, vector<64x128xf32> -> vector<64x128xf32>
    %34 = vector.shape_cast %33 : vector<64x128xf32> to vector<8x8x128xf32>
    %c0_48 = arith.constant 0 : index
    %c0_49 = arith.constant 0 : index
    %c0_50 = arith.constant 0 : index
    %35 = vector.load %arg5[%c0_48, %c0_49, %c0_50] : memref<8x8x128xf32, #tpu.memory_space<vmem>>, vector<8x8x128xf32>
    %36 = arith.addf %35, %34 : vector<8x8x128xf32>
    %c0_51 = arith.constant 0 : index
    %c0_52 = arith.constant 0 : index
    %c0_53 = arith.constant 0 : index
    %37 = vector.load %arg5[%c0_51, %c0_52, %c0_53] : memref<8x8x128xf32, #tpu.memory_space<vmem>>, vector<8x8x128xf32>
    tpu.vector_store %arg5[%c0_51, %c0_52, %c0_53], %36 {strides = array<i32>} : memref<8x8x128xf32, #tpu.memory_space<vmem>>, vector<8x8x128xf32>,
    %c0_54 = arith.constant 0 : index
    %c0_55 = arith.constant 0 : index
    %c0_56 = arith.constant 0 : index
    %38 = vector.load %arg5[%c0_54, %c0_55, %c0_56] : memref<8x8x128xf32, #tpu.memory_space<vmem>>, vector<8x8x128xf32>
    %cst_57 = arith.constant dense<0.000000e+00> : vector<128xf32>
    %39 = vector.multi_reduction <add>, %38, %cst_57 [0, 1] : vector<8x8x128xf32> to vector<128xf32>
    %40 = vector.shape_cast %39 : vector<128xf32> to vector<1x1x128xf32>
    %cst_58 = arith.constant 1.562500e-02 : f32
    %41 = vector.broadcast %cst_58 : f32 to vector<1x1x128xf32>
    %42 = arith.mulf %40, %41 : vector<1x1x128xf32>
    %c0_59 = arith.constant 0 : index
    %c0_60 = arith.constant 0 : index
    %c0_61 = arith.constant 0 : index
    %43 = vector.load %arg5[%c0_59, %c0_60, %c0_61] : memref<8x8x128xf32, #tpu.memory_space<vmem>>, vector<8x8x128xf32>
    %44 = vector.broadcast %42 : vector<1x1x128xf32> to vector<8x8x128xf32>
    %45 = arith.subf %43, %44 : vector<8x8x128xf32>
    %46 = arith.mulf %45, %45 : vector<8x8x128xf32>
    %cst_62 = arith.constant dense<0.000000e+00> : vector<128xf32>
    %47 = vector.multi_reduction <add>, %46, %cst_62 [0, 1] : vector<8x8x128xf32> to vector<128xf32>
    %48 = vector.shape_cast %47 : vector<128xf32> to vector<1x1x128xf32>
    %cst_63 = arith.constant 1.562500e-02 : f32
    %49 = vector.broadcast %cst_63 : f32 to vector<1x1x128xf32>
    %50 = arith.mulf %48, %49 : vector<1x1x128xf32>
    %c0_64 = arith.constant 0 : index
    %c0_65 = arith.constant 0 : index
    %c0_66 = arith.constant 0 : index
    %51 = vector.load %arg5[%c0_64, %c0_65, %c0_66] : memref<8x8x128xf32, #tpu.memory_space<vmem>>, vector<8x8x128xf32>
    %52 = vector.broadcast %42 : vector<1x1x128xf32> to vector<8x8x128xf32>
    %53 = arith.subf %51, %52 : vector<8x8x128xf32>
    %cst_67 = arith.constant 9.99999974E-6 : f32
    %54 = vector.broadcast %cst_67 : f32 to vector<1x1x128xf32>
    %55 = arith.addf %50, %54 : vector<1x1x128xf32>
    %56 = math.rsqrt %55 : vector<1x1x128xf32>
    %57 = vector.broadcast %56 : vector<1x1x128xf32> to vector<8x8x128xf32>
    %58 = arith.mulf %53, %57 : vector<8x8x128xf32>
    %cst_68 = arith.constant 0.000000e+00 : f32
    %59 = vector.broadcast %cst_68 : f32 to vector<8x8x128xf32>
    %60 = arith.cmpf oge, %58, %59 : vector<8x8x128xf32>
    %cst_69 = arith.constant 2.000000e-01 : f32
    %61 = vector.broadcast %cst_69 : f32 to vector<8x8x128xf32>
    %62 = arith.mulf %61, %58 : vector<8x8x128xf32>
    %63 = arith.select %60, %58, %62 : vector<8x8x128xi1>, vector<8x8x128xf32>
    %64 = arith.truncf %63 : vector<8x8x128xf32> to vector<8x8x128xbf16>
    %c0_70 = arith.constant 0 : index
    %c0_71 = arith.constant 0 : index
    %c0_72 = arith.constant 0 : index
    %c0_73 = arith.constant 0 : index
    %65 = vector.load %arg4[%c0_70, %c0_71, %c0_72, %c0_73] : memref<1x8x8x128xbf16, #tpu.memory_space<vmem>>, vector<1x8x8x128xbf16>
    %66 = vector.shape_cast %65 : vector<1x8x8x128xbf16> to vector<8x8x128xbf16>
    %67 = vector.shape_cast %64 : vector<8x8x128xbf16> to vector<1x8x8x128xbf16>
    tpu.vector_store %arg4[%c0_70, %c0_71, %c0_72, %c0_73], %67 {strides = array<i32>} : memref<1x8x8x128xbf16, #tpu.memory_space<vmem>>, vector<1x8x8x128xbf16>,
    return
  }
  func.func @transform_0(%arg0: i32, %arg1: i32) -> (i32, i32, i32, i32) {
    %c0_i32 = arith.constant 0 : i32
    %c0_i32_0 = arith.constant 0 : i32
    %c0_i32_1 = arith.constant 0 : i32
    %c0_i32_2 = arith.constant 0 : i32
    return %arg1, %c0_i32, %c0_i32_0, %c0_i32_1 : i32, i32, i32, i32
  }
  func.func @transform_1(%arg0: i32, %arg1: i32) -> (i32, i32, i32, i32) {
    %c0_i32 = arith.constant 0 : i32
    %c0_i32_0 = arith.constant 0 : i32
    %c0_i32_1 = arith.constant 0 : i32
    %c0_i32_2 = arith.constant 0 : i32
    return %c0_i32, %c0_i32_0, %c0_i32_1, %arg0 : i32, i32, i32, i32
  }
  func.func @transform_2(%arg0: i32, %arg1: i32) -> (i32, i32, i32, i32) {
    %c0_i32 = arith.constant 0 : i32
    %c0_i32_0 = arith.constant 0 : i32
    %c0_i32_1 = arith.constant 0 : i32
    return %arg1, %c0_i32, %c0_i32_0, %arg0 : i32, i32, i32, i32
  }
}

</mosaic_0001>

<bundles_post_ra>
// kernel: unet_down.1
= control target key start
LH: loop header
LB: loop body
LE: loop exit
PB: predicated region body
PF: predicated region fallthrough
CT: control target
= control target key end

     0   :  { %s1404_s9 = smov 0   ;;  %s1406_s10 = smov 0   ;;  %s1557_s0 = inlined_call_operand.vmem [shape: bf16[2,9,16,16], index: 0, kind: input, shape index: {}]   ;;  %s1558_s1 = inlined_call_operand.vmem [shape: bf16[2,2,16,128], index: 1, kind: input, shape index: {}]   ;;  %s1559_s2 = inlined_call_operand.vmem [shape: bf16[2,8,8,128], index: 2, kind: output, shape index: {}]  }
   0x1   :  { %s1408_s11 = smov 0  }
   0x2 LB: > { %s21_s12 = sadd.s32 1, %s1383_s10  ;;  %p1146_p0 = scmp.ge.s32.totalorder %s1387_s11, 1  ;;  %s1387_s11 = sphi %s1408_s11, %s12_s11   ;;  %s1383_s10 = sphi %s1406_s10, %s1563_s10   ;;  %s1379_s9 = sphi %s1404_s9, %s1562_s9  }
   0x3   : > { %p22_p1 = scmp.ge.s32.totalorder %s21_s12, 2  ;;  %p135_p2 = scmp.lt.s32.totalorder %s1387_s11, 3 }
   0x5   : > { %s1565_s12 = smov (%p22_p1, %s21_s12), 0  ;;  %p136_p3 = pnand %p1146_p0, %p135_p2 }
   0x6   : > { %v1351_v0 = vld [vmem:[%s1558_s1] sm:$0xff] (!%p136_p3)   ;;  %p164_p4 = scmp.lt.s32.totalorder (!%p136_p3), %s1379_s9, 1  ;;  %v1352_v1 = vld [vmem:[%s1558_s1 + $0x10] sm:$0xff] (!%p136_p3)   ;;  %v1354_v2 = vld [vmem:[%s1558_s1 + $0x8] sm:$0xff] (!%p136_p3)   ;;  %vm218_vm0 = vcmask (!%p136_p3), 130048  }
   0x7   : > { %139 = sbr.rel (%p136_p3) target bundleno = 360 (0x168), region = 28  ;;  %1262 = vmatprep.subr.bf16.mxu1 (!%p136_p3), %v1351_v0  ;;  %1282 = vmatprep.subr.bf16.mxu0 (!%p136_p3), %v1352_v1  ;;  %v1356_v3 = vld [vmem:[%s1558_s1 + $0x18] sm:$0xff] (!%p136_p3)   ;;  %vm320_vm1 = vsmask.f32 (!%p136_p3), 3328  ;;  %vm321_vm2 = vsmask.f32 (!%p136_p3), 7440 }
   0x8   : > { %1263 = vmatpush3.bf16.msra.mxu1 (!%p136_p3), %v1351_v0  ;;  %1283 = vmatpush3.bf16.msra.mxu0 (!%p136_p3), %v1352_v1  ;;  %vm1469_vm3 = vmor (!%p136_p3), %vm320_vm1, %vm321_vm2 }
   0x9   : > { %1272 = vmatprep.subr.bf16.mxu1 (!%p136_p3), %v1354_v2  ;;  %1292 = vmatprep.subr.bf16.mxu0 (!%p136_p3), %v1356_v3 }
   0xe   : > { %s1567_s9 = smov (!%p164_p4, %s1379_s9), 1 }
   0xf   : > { %s1326_s21 = smul.u32 72, %s1567_s9  ;;  %s1218_s25 = sshll.u32 %s1567_s9, 5 }
  0x10   : > { %s180_s28 = scalar_lea.vmem %s1559_s2, %s1218_s25 }
  0x11   : > { %s1440_s24 = scalar_lea.vmem %s1557_s0, %s1326_s21 }
  0x12   : > { %v1353_v4 = vld [vmem:[%s1440_s24] ss:$8 sps:$4 sm:$0xff]   ;;  %v1357_v6 = vld [vmem:[%s1440_s24 + $0x10] ss:$8 sps:$4 sm:$0xff]   ;;  %v305_v13 = vld [vmem:[%s1440_s24 + $0x4] sm:$0x1] }
  0x13   : > { %v1355_v5 = vld [vmem:[%s1440_s24 + $0x8] ss:$8 sps:$4 sm:$0xff]   ;;  %1264 = vmatprep.mubr.msk.bf16.mxu1 %vm218_vm0, %v1353_v4  ;;  %v1358_v7 = vld [vmem:[%s1440_s24 + $0x18] ss:$8 sps:$4 sm:$0xff]   ;;  %v307_v15 = vld [vmem:[%s1440_s24 + $0xc] sm:$0x1] }
  0x14   : > { %1284 = vmatprep.mubr.msk.bf16.mxu0 %vm218_vm0, %v1355_v5  ;;  %1265 = vmatmul.mubr.msk.bf16.vlgmr.msra.gmra.mrb[0].mxu1 %vm218_vm0, %v1357_v6  ;;  %v1359_v8 = vld [vmem:[%s1440_s24 + $0x20] ss:$8 sps:$4 sm:$0xff]   ;;  %v1361_v10 = vld [vmem:[%s1440_s24 + $0x30] ss:$8 sps:$4 sm:$0xff]   ;;  %v333_v18 = vshll.u32 %v305_v13, 16  ;;  %v347_v21 = vshll.u32 %v307_v15, 16 }
  0x15   : > { %1273 = vmatpush3.bf16.msra.mxu1 %v1354_v2  ;;  %1285 = vmatmul.mubr.msk.bf16.vlgmr.msra.gmra.mrb[0].mxu0 %vm218_vm0, %v1358_v7  ;;  %v1360_v9 = vld [vmem:[%s1440_s24 + $0x28] ss:$8 sps:$4 sm:$0xff]   ;;  %v1362_v11 = vld [vmem:[%s1440_s24 + $0x38] ss:$8 sps:$4 sm:$0xff]   ;;  %v1190_v23 = vld [vmem:[%s1440_s24 + $0xc] sm:$0x1] }
  0x16   : > { %1293 = vmatpush3.bf16.msra.mxu0 %v1356_v3  ;;  %1268 = vmatprep.mubr.msk.bf16.mxu1 %vm218_vm0, %v1359_v8  ;;  %v304_v12 = vld [vmem:[%s1440_s24] sm:$0xf]  ;;  %v306_v14 = vld [vmem:[%s1440_s24 + $0x8] sm:$0xf]  ;;  %v335_v26 = vrot.slane %v333_v18, 5  ;;  %v349_v30 = vrot.slane %v347_v21, 5 }
  0x17   : > { %1288 = vmatprep.mubr.msk.bf16.mxu0 %vm218_vm0, %v1360_v9  ;;  %v324_v16 = vshrl.u32 %v304_v12, 16  ;;  %v327_v17 = vshll.u32 %v304_v12, 16  ;;  %v338_v19 = vshrl.u32 %v306_v14, 16  ;;  %v341_v20 = vshll.u32 %v306_v14, 16  ;;  %v1189_v22 = vld [vmem:[%s1440_s24 + $0x8] sm:$0xf] }
  0x18   : > { %v1191_v28 = vld [vmem:[%s1440_s24 + $0x10] sm:$0xf]  ;;  %v1192_v31 = vld [vmem:[%s1440_s24 + $0x14] sm:$0x1]  ;;  %v713_v32 = vshrl.u32 %v1189_v22, 16  ;;  %v716_v33 = vshll.u32 %v1189_v22, 16 }
  0x19   : > { %v326_v24 = vrot.slane %v324_v16, 4  ;;  %v329_v25 = vrot.slane %v327_v17, 5  ;;  %v340_v27 = vrot.slane %v338_v19, 4  ;;  %v343_v29 = vrot.slane %v341_v20, 5  ;;  %v308_v38 = vld [vmem:[%s1440_s24 + $0x10] sm:$0xf] }
  0x1a   : > { %v722_v35 = vshll.u32 %v1190_v23, 16  ;;  %v727_v36 = vshrl.u32 %v1191_v28, 16  ;;  %v730_v37 = vshll.u32 %v1191_v28, 16  ;;  %v715_v41 = vrot.slane %v713_v32, 4  ;;  %v309_v44 = vld [vmem:[%s1440_s24 + $0x14] sm:$0x1] }
  0x1b   : > { %v330_v34 = vor.u32 %v329_v25, %v326_v24  ;;  %v344_v40 = vor.u32 %v343_v29, %v340_v27  ;;  %v718_v42 = vrot.slane %v716_v33, 5  ;;  %v736_v43 = vshll.u32 %v1192_v31, 16  ;;  %v310_v49 = vld [vmem:[%s1440_s24 + $0x18] sm:$0xf]  ;;  %v311_v56 = vld [vmem:[%s1440_s24 + $0x1c] sm:$0x1] }
  0x1c   : > { %1269 = vmatmul.mubr.msk.bf16.gmra.mrb[4].mxu1 %vm218_vm0, %v1361_v10  ;;  %v724_v46 = vrot.slane %v722_v35, 5  ;;  %v729_v47 = vrot.slane %v727_v36, 4  ;;  %v732_v48 = vrot.slane %v730_v37, 5  ;;  %v352_v53 = vshrl.u32 %v308_v38, 16  ;;  %v1193_v63 = vld [vmem:[%s1440_s24 + $0x18] sm:$0xf] }
  0x1d   : > { %1289 = vmatmul.mubr.msk.bf16.gmra.mrb[4].mxu0 %vm218_vm0, %v1362_v11  ;;  %v331_v45 = vrot.slane %v330_v34, 4  ;;  %v345_v50 = vrot.slane %v344_v40, 4  ;;  %v719_v51 = vor.u32 %v718_v42, %v715_v41  ;;  %v738_v52 = vrot.slane %v736_v43, 5  ;;  %v1194_v4 = vld [vmem:[%s1440_s24 + $0x1c] sm:$0x1] }
  0x1e   : > { %v733_v55 = vor.u32 %v732_v48, %v729_v47  ;;  %v355_v57 = vshll.u32 %v308_v38, 16  ;;  %v361_v58 = vshll.u32 %v309_v44, 16  ;;  %v354_v61 = vrot.slane %v352_v53, 4  ;;  %v1195_v9 = vld [vmem:[%s1440_s24 + $0x20] sm:$0xf] }
  0x1f   : > { %v336_v54 = vsel %vm1469_vm3, %v331_v45, %v335_v26  ;;  %v350_v59 = vsel %vm1469_vm3, %v345_v50, %v349_v30  ;;  %v720_v60 = vrot.slane %v719_v51, 4  ;;  %v366_v62 = vshrl.u32 %v310_v49, 16  ;;  %v1196_v12 = vld [vmem:[%s1440_s24 + $0x24] sm:$0x1]  ;;  %v312_v19 = vld [vmem:[%s1440_s24 + $0x20] sm:$0xf] }
  0x20   : > { %v1161_v0 = vcombine.low %v336_v54, %v350_v59  ;;  %v734_v1 = vrot.slane %v733_v55, 4  ;;  %v357_v2 = vrot.slane %v355_v57, 5  ;;  %v363_v3 = vrot.slane %v361_v58, 5  ;;  %v313_v24 = vld [vmem:[%s1440_s24 + $0x24] sm:$0x1] }
  0x21   : > { %v725_v5 = vsel %vm1469_vm3, %v720_v60, %v724_v46  ;;  %v368_v6 = vrot.slane %v366_v62, 4  ;;  %v369_v7 = vshll.u32 %v310_v49, 16  ;;  %v375_v8 = vshll.u32 %v311_v56, 16  ;;  %v314_v29 = vld [vmem:[%s1440_s24 + $0x28] sm:$0xf] }
  0x22   : > { %1274 = vmatprep.mubr.msk.bf16.mxu1 %vm218_vm0, %v1161_v0  ;;  %v739_v10 = vsel %vm1469_vm3, %v734_v1, %v738_v52  ;;  %v358_v11 = vor.u32 %v357_v2, %v354_v61  ;;  %v741_v13 = vshrl.u32 %v1193_v63, 16  ;;  %v744_v14 = vshll.u32 %v1193_v63, 16  ;;  %v315_v37 = vld [vmem:[%s1440_s24 + $0x2c] sm:$0x1]  ;;  %v1197_v44 = vld [vmem:[%s1440_s24 + $0x28] sm:$0xf] }
  0x23   : > { %v1207_v15 = vcombine.low %v725_v5, %v739_v10  ;;  %v371_v16 = vrot.slane %v369_v7, 5  ;;  %v377_v17 = vrot.slane %v375_v8, 5  ;;  %v750_v18 = vshll.u32 %v1194_v4, 16  ;;  %v1198_v49 = vld [vmem:[%s1440_s24 + $0x2c] sm:$0x1] }
  0x24   : > { %v359_v20 = vrot.slane %v358_v11, 4  ;;  %v743_v21 = vrot.slane %v741_v13, 4  ;;  %v746_v22 = vrot.slane %v744_v14, 5  ;;  %v755_v23 = vshrl.u32 %v1195_v9, 16  ;;  %v1199_v50 = vld [vmem:[%s1440_s24 + $0x30] sm:$0xf] }
  0x25   : > { %1294 = vmatprep.mubr.msk.bf16.mxu0 %vm218_vm0, %v1207_v15  ;;  %v372_v25 = vor.u32 %v371_v16, %v368_v6  ;;  %v752_v26 = vrot.slane %v750_v18, 5  ;;  %v758_v27 = vshll.u32 %v1195_v9, 16  ;;  %v764_v28 = vshll.u32 %v1196_v12, 16  ;;  %v1200_v59 = vld [vmem:[%s1440_s24 + $0x34] sm:$0x1] }
  0x26   : > { %v364_v30 = vsel %vm1469_vm3, %v359_v20, %v363_v3  ;;  %v747_v31 = vor.u32 %v746_v22, %v743_v21  ;;  %v757_v32 = vrot.slane %v755_v23, 4  ;;  %v380_v33 = vshrl.u32 %v312_v19, 16  ;;  %v316_v4 = vld [vmem:[%s1440_s24 + $0x30] sm:$0xf]  ;;  %v317_v5 = vld [vmem:[%s1440_s24 + $0x34] sm:$0x1] }
  0x27   : > { %v373_v34 = vrot.slane %v372_v25, 4  ;;  %v760_v35 = vrot.slane %v758_v27, 5  ;;  %v766_v36 = vrot.slane %v764_v28, 5  ;;  %v383_v38 = vshll.u32 %v312_v19, 16  ;;  %v318_v10 = vld [vmem:[%s1440_s24 + $0x38] sm:$0xf] }
  0x28   : > { %v748_v40 = vrot.slane %v747_v31, 4  ;;  %v382_v41 = vrot.slane %v380_v33, 4  ;;  %v389_v42 = vshll.u32 %v313_v24, 16  ;;  %v394_v43 = vshrl.u32 %v314_v29, 16  ;;  %v1201_v24 = vld [vmem:[%s1440_s24 + $0x38] sm:$0xf] }
  0x29   : > { %v378_v45 = vsel %vm1469_vm3, %v373_v34, %v377_v17  ;;  %v761_v46 = vor.u32 %v760_v35, %v757_v32  ;;  %v385_v47 = vrot.slane %v383_v38, 5  ;;  %v397_v48 = vshll.u32 %v314_v29, 16  ;;  %v319_v17 = vld [vmem:[%s1440_s24 + $0x3c] sm:$0x1]  ;;  %v1203_v33 = vld [vmem:[%s1440_s24 + $0x40] sm:$0xf] }
  0x2a   : > { %v1162_v51 = vcombine.low %v364_v30, %v378_v45  ;;  %v753_v52 = vsel %vm1469_vm3, %v748_v40, %v752_v26  ;;  %v391_v53 = vrot.slane %v389_v42, 5  ;;  %v396_v54 = vrot.slane %v394_v43, 4  ;;  %v1202_v28 = vld [vmem:[%s1440_s24 + $0x3c] sm:$0x1] }
  0x2b   : > { %v762_v55 = vrot.slane %v761_v46, 4  ;;  %v386_v56 = vor.u32 %v385_v47, %v382_v41  ;;  %v399_v57 = vrot.slane %v397_v48, 5  ;;  %v403_v58 = vshll.u32 %v315_v37, 16 }
  0x2c   : > { %1275 = vmatmul.mubr.msk.bf16.vlgmr.msra.gmra.mrb[0].mxu1 %vm218_vm0, %v1162_v51  ;;  %v769_v60 = vshrl.u32 %v1197_v44, 16  ;;  %v772_v61 = vshll.u32 %v1197_v44, 16  ;;  %v778_v62 = vshll.u32 %v1198_v49, 16  ;;  %v783_v63 = vshrl.u32 %v1199_v50, 16  ;;  %v1204_v44 = vld [vmem:[%s1440_s24 + $0x44] sm:$0x1] }
  0x2d   : > { %v767_v0 = vsel %vm1469_vm3, %v762_v55, %v766_v36  ;;  %v387_v1 = vrot.slane %v386_v56, 4  ;;  %v400_v2 = vor.u32 %v399_v57, %v396_v54  ;;  %v405_v3 = vrot.slane %v403_v58, 5 }
  0x2e   : > { %v1208_v6 = vcombine.low %v753_v52, %v767_v0  ;;  %v771_v7 = vrot.slane %v769_v60, 4  ;;  %v774_v8 = vrot.slane %v772_v61, 5  ;;  %v780_v9 = vrot.slane %v778_v62, 5 }
  0x2f   : > { %v392_v11 = vsel %vm1469_vm3, %v387_v1, %v391_v53  ;;  %v401_v12 = vrot.slane %v400_v2, 4  ;;  %v785_v13 = vrot.slane %v783_v63, 4  ;;  %v786_v14 = vshll.u32 %v1199_v50, 16 }
  0x30   : > { %1295 = vmatmul.mubr.msk.bf16.vlgmr.msra.gmra.mrb[0].mxu0 %vm218_vm0, %v1208_v6  ;;  %v775_v15 = vor.u32 %v774_v8, %v771_v7  ;;  %v792_v16 = vshll.u32 %v1200_v59, 16  ;;  %v408_v18 = vshrl.u32 %v316_v4, 16  ;;  %v411_v19 = vshll.u32 %v316_v4, 16 }
  0x31   : > { %v406_v20 = vsel %vm1469_vm3, %v401_v12, %v405_v3  ;;  %v788_v21 = vrot.slane %v786_v14, 5  ;;  %v417_v22 = vshll.u32 %v317_v5, 16  ;;  %v422_v23 = vshrl.u32 %v318_v10, 16 }
  0x32   : > { %v1163_v25 = vcombine.low %v392_v11, %v406_v20  ;;  %v776_v26 = vrot.slane %v775_v15, 4  ;;  %v410_v27 = vrot.slane %v408_v18, 4  ;;  %v794_v30 = vrot.slane %v792_v16, 5 }
  0x33   : > { %v789_v29 = vor.u32 %v788_v21, %v785_v13  ;;  %v413_v31 = vrot.slane %v411_v19, 5  ;;  %v419_v32 = vrot.slane %v417_v22, 5  ;;  %v424_v34 = vrot.slane %v422_v23, 4 }
  0x34   : > { %1278 = vmatprep.mubr.msk.bf16.mxu1 %vm218_vm0, %v1163_v25  ;;  %v425_v35 = vshll.u32 %v318_v10, 16  ;;  %v431_v36 = vshll.u32 %v319_v17, 16  ;;  %v797_v37 = vshrl.u32 %v1201_v24, 16  ;;  %v781_v38 = vsel %vm1469_vm3, %v776_v26, %v780_v9 }
  0x35   : > { %v790_v40 = vrot.slane %v789_v29, 4  ;;  %v414_v41 = vor.u32 %v413_v31, %v410_v27  ;;  %v800_v42 = vshll.u32 %v1201_v24, 16  ;;  %v806_v46 = vshll.u32 %v1202_v28, 16 }
  0x36   : > { %v427_v43 = vrot.slane %v425_v35, 5  ;;  %v799_v45 = vrot.slane %v797_v37, 4  ;;  %v811_v47 = vshrl.u32 %v1203_v33, 16  ;;  %v433_v50 = vrot.slane %v431_v36, 5 }
  0x37   : > { %v795_v48 = vsel %vm1469_vm3, %v790_v40, %v794_v30  ;;  %v415_v49 = vrot.slane %v414_v41, 4  ;;  %v802_v51 = vrot.slane %v800_v42, 5  ;;  %v814_v55 = vshll.u32 %v1203_v33, 16 }
  0x38   : > { %v1209_v52 = vcombine.low %v781_v38, %v795_v48  ;;  %v428_v53 = vor.u32 %v427_v43, %v424_v34  ;;  %v813_v54 = vrot.slane %v811_v47, 4  ;;  %v820_v57 = vshll.u32 %v1204_v44, 16 }
  0x39   : > { %v803_v56 = vor.u32 %v802_v51, %v799_v45  ;;  %v420_v58 = vsel %vm1469_vm3, %v415_v49, %v419_v32  ;;  %v808_v60 = vrot.slane %v806_v46, 5  ;;  %v816_v61 = vrot.slane %v814_v55, 5 }
  0x3a   : > { %1298 = vmatprep.mubr.msk.bf16.mxu0 %vm218_vm0, %v1209_v52  ;;  %v429_v59 = vrot.slane %v428_v53, 4  ;;  %v822_v1 = vrot.slane %v820_v57, 5 }
  0x3b   : > { %v804_v62 = vrot.slane %v803_v56, 4  ;;  %v817_v0 = vor.u32 %v816_v61, %v813_v54 }
  0x3c   : > { %v434_v63 = vsel %vm1469_vm3, %v429_v59, %v433_v50 }
  0x3d   : > { %v1164_v2 = vcombine.low %v420_v58, %v434_v63  ;;  %v809_v3 = vsel %vm1469_vm3, %v804_v62, %v808_v60  ;;  %v818_v4 = vrot.slane %v817_v0, 4 }
  0x3f   : > { %1279 = vmatmul.mubr.msk.bf16.gmra.mrb[4].mxu1 %vm218_vm0, %v1164_v2  ;;  %v823_v5 = vsel %vm1469_vm3, %v818_v4, %v822_v1 }
  0x40   : > { %v1210_v6 = vcombine.low %v809_v3, %v823_v5 }
  0x42   : > { %1299 = vmatmul.mubr.msk.bf16.gmra.mrb[4].mxu0 %vm218_vm0, %v1210_v6 }
  0xff   : > { %v1276_v7 = vpop.f32.mrb[0].mxu1 }
 0x100   : > { %v502_v8 = vpop.f32.mrb[1].mxu1 }
 0x101   : > { %v1277_v9 = vpop.f32.mrb[2].mxu1 }
 0x102   : > { %v505_v10 = vpop.f32.mrb[3].mxu1 }
 0x103   : > { %v1296_v11 = vpop.f32.mrb[0].mxu0 }
 0x104   : > { %v1302_v12 = vadd.f32 %v1296_v11, %v1276_v7  ;;  %v891_v13 = vpop.f32.mrb[1].mxu0 }
 0x105   : > { %v1303_v14 = vadd.f32 %v891_v13, %v502_v8  ;;  %v1297_v15 = vpop.f32.mrb[2].mxu0 }
 0x106   : > { %v1304_v16 = vadd.f32 %v1297_v15, %v1277_v9  ;;  %v894_v17 = vpop.f32.mrb[3].mxu0 }
 0x107   : > { %v1305_v18 = vadd.f32 %v894_v17, %v505_v10 }
 0x109   : > { %v954_v19 = vadd.f32 %v1305_v18, %v1303_v14 }
 0x10b   : > { %v955_v20 = vadd.f32 %v1302_v12, %v954_v19 }
 0x10d   : > { %v956_v21 = vadd.f32 %v1304_v16, %v955_v20 }
 0x112   : > { %v1280_v39 = vpop.f32.mrb[4].mxu1 }
 0x113   : > { %v518_v22 = vpop.f32.mrb[5].mxu1 }
 0x114   : > { %v1281_v23 = vpop.f32.mrb[6].mxu1 }
 0x115   : > { %v521_v24 = vpop.f32.mrb[7].mxu1  ;;  %v1300_v25 = vpop.f32.mrb[4].mxu0 }
 0x116   : > { %v1306_v26 = vadd.f32 %v1300_v25, %v1280_v39  ;;  %v907_v27 = vpop.f32.mrb[5].mxu0 }
 0x117   : > { %v1307_v28 = vadd.f32 %v907_v27, %v518_v22  ;;  %v1301_v29 = vpop.f32.mrb[6].mxu0 }
 0x118   : > { %v1308_v30 = vadd.f32 %v1301_v29, %v1281_v23  ;;  %v910_v31 = vpop.f32.mrb[7].mxu0 }
 0x119   : > { %v957_v32 = vadd.f32 %v1307_v28, %v956_v21  ;;  %v1309_v33 = vadd.f32 %v910_v31, %v521_v24 }
 0x11b   : > { %v958_v34 = vadd.f32 %v1309_v33, %v957_v32 }
 0x11d   : > { %v959_v35 = vadd.f32 %v1306_v26, %v958_v34 }
 0x11f   : > { %v960_v36 = vadd.f32 %v1308_v30, %v959_v35 }
 0x121   : > { %v961_v37 = vrot.slane %v960_v36, 4 }
 0x123   : > { %v962_v38 = vadd.f32 %v961_v37, %v960_v36 }
 0x125   : > { %v963_v40 = vrot.slane %v962_v38, 2 }
 0x127   : > { %v964_v41 = vadd.f32 %v963_v40, %v962_v38 }
 0x129   : > { %v965_v42 = vrot.slane %v964_v41, 1 }
 0x12b   : > { %v966_v43 = vadd.f32 %v965_v42, %v964_v41 }
 0x12d   : > { %v967_v44 = vmul.f32 0.015625, %v966_v43 }
 0x12f   : > { %v968_v45 = vsub.f32 %v1303_v14, %v967_v44  ;;  %v969_v46 = vsub.f32 %v1305_v18, %v967_v44  ;;  %v970_v47 = vsub.f32 %v1302_v12, %v967_v44  ;;  %v971_v48 = vsub.f32 %v1304_v16, %v967_v44 }
 0x130   : > { %v972_v49 = vsub.f32 %v1307_v28, %v967_v44  ;;  %v973_v50 = vsub.f32 %v1309_v33, %v967_v44  ;;  %v974_v51 = vsub.f32 %v1306_v26, %v967_v44  ;;  %v975_v52 = vsub.f32 %v1308_v30, %v967_v44 }
 0x131   : > { %v976_v53 = vmul.f32 %v968_v45, %v968_v45  ;;  %v977_v54 = vmul.f32 %v969_v46, %v969_v46  ;;  %v978_v55 = vmul.f32 %v970_v47, %v970_v47  ;;  %v979_v57 = vmul.f32 %v971_v48, %v971_v48 }
 0x132   : > { %v980_v59 = vmul.f32 %v972_v49, %v972_v49  ;;  %v981_v61 = vmul.f32 %v973_v50, %v973_v50  ;;  %v982_v63 = vmul.f32 %v974_v51, %v974_v51  ;;  %v983_v1 = vmul.f32 %v975_v52, %v975_v52 }
 0x133   : > { %v984_v56 = vadd.f32 %v977_v54, %v976_v53 }
 0x135   : > { %v985_v58 = vadd.f32 %v984_v56, %v978_v55 }
 0x137   : > { %v986_v60 = vadd.f32 %v985_v58, %v979_v57 }
 0x139   : > { %v987_v62 = vadd.f32 %v986_v60, %v980_v59 }
 0x13b   : > { %v988_v0 = vadd.f32 %v987_v62, %v981_v61 }
 0x13d   : > { %v989_v2 = vadd.f32 %v988_v0, %v982_v63 }
 0x13f   : > { %v990_v3 = vadd.f32 %v989_v2, %v983_v1 }
 0x141   : > { %v991_v4 = vrot.slane %v990_v3, 4 }
 0x143   : > { %v992_v5 = vadd.f32 %v991_v4, %v990_v3 }
 0x145   : > { %v993_v6 = vrot.slane %v992_v5, 2 }
 0x147   : > { %v994_v7 = vadd.f32 %v993_v6, %v992_v5 }
 0x149   : > { %v995_v8 = vrot.slane %v994_v7, 1 }
 0x14b   : > { %v996_v9 = vadd.f32 %v995_v8, %v994_v7 }
 0x14d   : > { %v997_v10 = vmul.f32 0.015625, %v996_v9 }
 0x14f   : > { %v998_v11 = vadd.f32 1e-05, %v997_v10 }
 0x151   : > { %1363 = vrsqrt.f32 %v998_v11 }
 0x15b   : > { %v1364_v12 = vpop.eup %1363 }
 0x15c   : > { %v1000_v13 = vmul.f32 %v1364_v12, %v968_v45  ;;  %v1001_v14 = vmul.f32 %v1364_v12, %v969_v46  ;;  %v1002_v15 = vmul.f32 %v1364_v12, %v970_v47  ;;  %v1003_v16 = vmul.f32 %v1364_v12, %v971_v48 }
 0x15d   : > { %v1004_v17 = vmul.f32 %v1364_v12, %v972_v49  ;;  %v1005_v18 = vmul.f32 %v1364_v12, %v973_v50  ;;  %v1006_v19 = vmul.f32 %v1364_v12, %v974_v51  ;;  %v1007_v20 = vmul.f32 %v1364_v12, %v975_v52 }
 0x15e   : > { %vm1008_vm4 = vcmp.ge.f32.partialorder %v1000_v13, 0.0  ;;  %vm1009_vm5 = vcmp.ge.f32.partialorder %v1001_v14, 0.0  ;;  %vm1010_vm6 = vcmp.ge.f32.partialorder %v1002_v15, 0.0  ;;  %vm1011_vm7 = vcmp.ge.f32.partialorder %v1003_v16, 0.0 }
 0x15f   : > { %vm1012_vm8 = vcmp.ge.f32.partialorder %v1004_v17, 0.0  ;;  %vm1013_vm9 = vcmp.ge.f32.partialorder %v1005_v18, 0.0  ;;  %vm1014_vm10 = vcmp.ge.f32.partialorder %v1006_v19, 0.0  ;;  %vm1015_vm11 = vcmp.ge.f32.partialorder %v1007_v20, 0.0 }
 0x160   : > { %v1016_v21 = vmul.f32 0.2, %v1000_v13  ;;  %v1017_v39 = vmul.f32 0.2, %v1001_v14  ;;  %v1018_v22 = vmul.f32 0.2, %v1002_v15 }
 0x161   : > { %v1019_v23 = vmul.f32 0.2, %v1003_v16  ;;  %v1020_v24 = vmul.f32 0.2, %v1004_v17  ;;  %v1021_v25 = vmul.f32 0.2, %v1005_v18 }
 0x162   : > { %v1022_v26 = vmul.f32 0.2, %v1006_v19  ;;  %v1023_v27 = vmul.f32 0.2, %v1007_v20  ;;  %v1024_v28 = vsel %vm1008_vm4, %v1000_v13, %v1016_v21  ;;  %v1025_v29 = vsel %vm1009_vm5, %v1001_v14, %v1017_v39 }
 0x163   : > { %v1026_v30 = vsel %vm1010_vm6, %v1002_v15, %v1018_v22  ;;  %v1027_v31 = vsel %vm1011_vm7, %v1003_v16, %v1019_v23  ;;  %v1028_v32 = vsel %vm1012_vm8, %v1004_v17, %v1020_v24  ;;  %v1029_v33 = vsel %vm1013_vm9, %v1005_v18, %v1021_v25 }
 0x164   : > { %v1030_v34 = vsel %vm1014_vm10, %v1006_v19, %v1022_v26  ;;  %v1031_v35 = vsel %vm1015_vm11, %v1007_v20, %v1023_v27  ;;  %v1222_v36 = vpack.c.bf16 %v1025_v29, %v1024_v28  ;;  %v1227_v37 = vpack.c.bf16 %v1027_v31, %v1026_v30 }
 0x165   : > { %v1232_v38 = vpack.c.bf16 %v1029_v33, %v1028_v32  ;;  %v1237_v40 = vpack.c.bf16 %v1031_v35, %v1030_v34 }
 0x166   : > { %1223 = vst [vmem:[%s180_s28] sm:$0xff] %v1222_v36   ;;  %1239 = vst [vmem:[%s180_s28 + $0x8] sm:$0xff] %v1227_v37  }
 0x167   : > { %1240 = vst [vmem:[%s180_s28 + $0x10] sm:$0xff] %v1232_v38   ;;  %1241 = vst [vmem:[%s180_s28 + $0x18] sm:$0xff] %v1237_v40  }
 0x168 PF: > { %s12_s11 = sadd.s32 1, %s1387_s11   ;;  %s1562_s9 = smov %s1383_s10 }
 0x169   : > { %p9_p5 = scmp.ge.s32.totalorder %s12_s11, 4   ;;  %s1563_s10 = smov %s1565_s12 }
 0x16b   :  { %11 = sbr.rel (!%p9_p5) target bundleno = 2 (0x2), region = 65 }

</bundles_post_ra>
